<compile_context>
chip_gen: v7x
topology: tpu7x:2x2x1
jax: 0.10.0
libtpu: 0.0.40
codegen_flags: <defaults>
</compile_context>

<pallas_src>
import jax
import jax.numpy as jnp
from jax.experimental import pallas as pl
from jax.experimental.pallas import tpu as pltpu

NEG_INF = -1e30  # finite stand-in for -INF used by masked_fill_ (representable in bf16)


def genpool_kernel(feat_ref, bias_ref, w1_ref, b1_ref, w2_ref, out_ref):
    # feat_ref: (TB, S, D) native dtype   bias_ref: (TB, S, 1) bf16 additive mask bias
    # w1_ref:  (D, H*dh) feature dtype    b1_ref:  (1, H*dh) f32
    # w2_ref:  (H*dh, D) block-diagonal fused head weights, feature dtype
    # out_ref: (TB, D) feature dtype — sublane/lane-dense pooled output
    TB, S, D = feat_ref.shape
    x = feat_ref[...]
    # Free relabel: S is padded to the sublane tile of the feature dtype in the
    # wrapper, and the lane axis D is untouched by the collapse.
    x2 = x.reshape(TB * S, D)

    # Two fused, lane-dense MXU matmuls (f32 accumulate) instead of 2*H per-head
    # micro-matmuls. b2 is dropped entirely (cancels under softmax over S).
    s1 = jnp.dot(x2, w1_ref[...], preferred_element_type=jnp.float32) + b1_ref[...]
    a = jnp.maximum(s1, 0.0)                               # ReLU; dropouts = identity
    s2 = jnp.dot(a.astype(w2_ref.dtype), w2_ref[...],
                 preferred_element_type=jnp.float32).reshape(TB, S, D)

    # Additive -inf mask bias (bf16 stream widened here), broadcast over lanes.
    s2 = s2 + bias_ref[...].astype(jnp.float32)

    # torch softmax(dim=2) == per-column softmax over the sequence axis, with the
    # normalization deferred until after the weighted reduction over S.
    xf = x.astype(jnp.float32)
    mx = jnp.max(s2, axis=1, keepdims=True)                # (TB, 1, D)
    e = jnp.exp(s2 - mx)                                   # (TB, S, D)
    num = jnp.sum(e * xf, axis=1)                          # (TB, D)
    den = jnp.sum(e, axis=1)                               # (TB, D)
    # Exact divide on the tiny reduced row (negligible cost, no approx error).
    out_ref[...] = (num / den).astype(out_ref.dtype)


def _sublane_tile(dtype):
    return {4: 8, 2: 16, 1: 32}[jnp.dtype(dtype).itemsize]


def _vmem_limits():
    """Generation-aware VMEM sizing (v5e/v6e: 128 MiB physical, v7x: 64 MiB)."""
    cap = 64 << 20  # conservative fallback (v7x)
    try:
        cap = int(getattr(pltpu.get_tpu_info(), "vmem_capacity_bytes", cap))
    except Exception:
        pass
    vmem_limit = min(cap * 3 // 4, 100 << 20)   # 96 MiB on v5e/v6e, 48 MiB on v7x
    budget = vmem_limit // 2                    # tile heuristic keeps 2x headroom
    return vmem_limit, budget


def _pick_batch_tile(B, S, D, h_dh, feat_itemsize, budget_bytes, out_sub):
    """Largest batch tile whose DMA blocks + f32 intermediates fit the budget.

    TB must be a multiple of the output sublane tile (or the whole batch) so the
    (TB, D) output block is layout-legal. Prefer an even step count >= 4 so both
    v7x TensorCores get >= 2 pipelined steps each; then >= 2 steps; then max."""
    dp, hp = max(D, 128), max(h_dh, 128)

    def fits(tb):
        feat = 2 * tb * S * D * feat_itemsize       # double-buffered feature block
        msk = 2 * tb * S * 2                        # double-buffered bf16 mask bias
        inter = tb * S * (2 * hp + 3 * dp) * 4      # s1/a + s2/e/xf f32 slabs (lane-padded)
        return feat + msk + inter <= budget_bytes

    shape_ok = [t for t in range(1, B + 1)
                if B % t == 0 and (t % out_sub == 0 or t == B)]
    fitting = [t for t in shape_ok if fits(t)]
    if not fitting:
        # TODO(synk): production-scale S can leave nothing under budget; the
        # S-chunked online-softmax path (second 'arbitrary' grid axis over S with
        # running max/num/den scratch) would cap the live slabs instead.
        return min(shape_ok)
    for pred in (lambda t: (B // t) >= 4 and (B // t) % 2 == 0,   # 2 TCs x >=2 steps
                 lambda t: (B // t) >= 2):
        cands = [t for t in fitting if pred(t)]
        if cands:
            return max(cands)
    return max(fitting)


def genpool_pallas(features, mask, w1, b1, w2, b2):
    B, S, D = features.shape
    H, _, dh = w1.shape
    do = w2.shape[2]
    assert H * do == D
    del b2  # per-output-column constant: cancels exactly under the softmax over S

    fdt = features.dtype
    f_sub = _sublane_tile(fdt)      # sublane tile of the feature dtype
    out_sub = f_sub                 # output has the same dtype

    # --- alignment padding (static-shape checks; skipped when already aligned) --
    Sp = -(-S // f_sub) * f_sub
    Bp = -(-B // out_sub) * out_sub
    featp, maskp = features, mask
    if Sp != S:
        featp = jnp.pad(featp, ((0, 0), (0, Sp - S), (0, 0)))
        maskp = jnp.pad(maskp, ((0, 0), (0, Sp - S)), constant_values=True)
    if Bp != B:
        featp = jnp.pad(featp, ((0, Bp - B), (0, 0), (0, 0)))
        maskp = jnp.pad(maskp, ((0, Bp - B), (0, 0)), constant_values=True)
    # Additive mask bias, shipped at half width (bf16) and widened in-kernel.
    mbias = jnp.where(maskp, NEG_INF, 0.0).astype(jnp.bfloat16).reshape(Bp, Sp, 1)

    # --- wrapper-side weight fusion (trace-time, tiny) ---------------------------
    # w1 (H, D, dh) -> (D, H*dh); matmul inputs stay in the feature dtype.
    w1f = jnp.transpose(w1, (1, 0, 2)).reshape(D, H * dh).astype(fdt)
    b1f = b1.reshape(1, H * dh).astype(jnp.float32)
    # w2 (H, dh, do) -> block-diagonal (H*dh, H*do = D), head-major output layout
    # matching torch's transpose(1, 2).reshape.
    eye = jnp.eye(H, dtype=jnp.float32)
    w2f = (w2.astype(jnp.float32)[:, :, None, :] * eye[:, None, :, None]
           ).reshape(H * dh, H * do).astype(fdt)

    vmem_limit, budget = _vmem_limits()
    TB = _pick_batch_tile(Bp, Sp, D, H * dh, jnp.dtype(fdt).itemsize, budget, out_sub)
    grid = (Bp // TB,)

    # TODO(synk): weights are grid-invariant; mark with pipeline_mode=pl.Buffered(1)
    # (or stage into scratch once) if D / d_attn grow large enough to matter.
    out = pl.pallas_call(
        genpool_kernel,
        out_shape=jax.ShapeDtypeStruct((Bp, D), fdt),
        grid_spec=pltpu.PrefetchScalarGridSpec(
            num_scalar_prefetch=0,
            grid=grid,
            in_specs=[
                pl.BlockSpec((TB, Sp, D), lambda b: (b, 0, 0)),    # features (native dtype)
                pl.BlockSpec((TB, Sp, 1), lambda b: (b, 0, 0)),    # bf16 mask bias
                pl.BlockSpec((D, H * dh), lambda b: (0, 0)),       # fused w1 (replicated)
                pl.BlockSpec((1, H * dh), lambda b: (0, 0)),       # fused b1
                pl.BlockSpec((H * dh, D), lambda b: (0, 0)),       # block-diag w2
            ],
            out_specs=pl.BlockSpec((TB, D), lambda b: (b, 0)),     # lane/sublane-dense
        ),
        compiler_params=pltpu.CompilerParams(
            dimension_semantics=("parallel",),
            vmem_limit_bytes=vmem_limit,
        ),
    )(featp, mbias, w1f, b1f, w2f)
    return out[:B] if Bp != B else out


def genpool_ref(features, mask, w1, b1, w2, b2):
    """Pure-JAX reference mirroring the PyTorch forward (eval mode)."""
    B, S, D = features.shape
    s1 = jnp.einsum('bsd,hde->bhse', features, w1) + b1[None, :, None, :]
    a = jax.nn.relu(s1)
    s2 = jnp.einsum('bhse,heo->bhso', a, w2) + b2[None, :, None, :]
    s2 = jnp.where(mask[:, None, :, None], NEG_INF, s2)
    sm = jax.nn.softmax(s2, axis=2)                               # softmax over seq
    sm = jnp.transpose(sm, (0, 2, 1, 3)).reshape(B, S, D)
    return jnp.sum(features * sm, axis=1)


if __name__ == "__main__":
    # d_input=32, d_attn=16, n_heads=4 -> d_head=4, d_head_output=8
    B, S, D = 2, 8, 32
    H, d_attn = 4, 16
    dh = d_attn // H
    do = D // H

    key = jax.random.PRNGKey(0)
    k1, k2, k3, k4, k5 = jax.random.split(key, 5)
    features = jax.random.normal(k1, (B, S, D), dtype=jnp.float32)
    # True = masked-out position; keep at least one valid position per row
    mask = jnp.zeros((B, S), dtype=bool).at[1, S - 2:].set(True)

    # Module __init__ uses zeros; use small deterministic randoms for a non-trivial test.
    w1 = 0.1 * jax.random.normal(k2, (H, D, dh), dtype=jnp.float32)
    b1 = 0.1 * jax.random.normal(k3, (H, dh), dtype=jnp.float32)
    w2 = 0.1 * jax.random.normal(k4, (H, dh, do), dtype=jnp.float32)
    b2 = 0.1 * jax.random.normal(k5, (H, do), dtype=jnp.float32)

    out = jax.block_until_ready(genpool_pallas(features, mask, w1, b1, w2, b2))
    ref = genpool_ref(features, mask, w1, b1, w2, b2)

    assert out.shape == (B, D), out.shape
    max_err = float(jnp.max(jnp.abs(out - ref)))
    assert jnp.allclose(out, ref, atol=1e-4, rtol=1e-4), f"max abs err {max_err}"
    print("KERNEL_OK")
</pallas_src>

<mosaic_0001>
module attributes {stable_mosaic.version = 11 : i64} {
  func.func @genpool_kernel(%arg0: i32, %arg1: memref<8x8x32xf32, #tpu.memory_space<vmem>>, %arg2: memref<8x8x1xbf16, #tpu.memory_space<vmem>>, %arg3: memref<32x16xf32, #tpu.memory_space<vmem>>, %arg4: memref<1x16xf32, #tpu.memory_space<vmem>>, %arg5: memref<16x32xf32, #tpu.memory_space<vmem>>, %arg6: memref<8x32xf32, #tpu.memory_space<vmem>>) attributes {dimension_semantics = [#tpu.dimension_semantics<parallel>], iteration_bounds = array<i64: 1>, scalar_prefetch = 0 : i64, scratch_operands = 0 : i64, tpu.core_type = #tpu.core_type<tc>, window_params = [{transform_indices = @transform_0, window_bounds = array<i64: 8, 8, 32>}, {transform_indices = @transform_1, window_bounds = array<i64: 8, 8, 1>}, {pipeline_mode = #tpu.pipeline_mode<synchronous>, transform_indices = @transform_2, window_bounds = array<i64: 32, 16>}, {pipeline_mode = #tpu.pipeline_mode<synchronous>, transform_indices = @transform_3, window_bounds = array<i64: 1, 16>}, {pipeline_mode = #tpu.pipeline_mode<synchronous>, transform_indices = @transform_4, window_bounds = array<i64: 16, 32>}, {transform_indices = @transform_5, window_bounds = array<i64: 8, 32>}]} {
    %c0 = arith.constant 0 : index
    %c0_0 = arith.constant 0 : index
    %c0_1 = arith.constant 0 : index
    %0 = vector.load %arg1[%c0, %c0_0, %c0_1] : memref<8x8x32xf32, #tpu.memory_space<vmem>>, vector<8x8x32xf32>
    %1 = vector.shape_cast %0 : vector<8x8x32xf32> to vector<64x32xf32>
    %c0_2 = arith.constant 0 : index
    %c0_3 = arith.constant 0 : index
    %2 = vector.load %arg3[%c0_2, %c0_3] : memref<32x16xf32, #tpu.memory_space<vmem>>, vector<32x16xf32>
    %cst = arith.constant dense<0.000000e+00> : vector<64x16xf32>
    %3 = tpu.matmul %1, %2, %cst {dimension_numbers = #tpu.dot_dimension_numbers<[1], [0], [0], [1], [0, 0, 1, 1], [], []>} : vector<64x32xf32>, vector<32x16xf32>, vector<64x16xf32> -> vector<64x16xf32>
    %c0_4 = arith.constant 0 : index
    %c0_5 = arith.constant 0 : index
    %4 = vector.load %arg4[%c0_4, %c0_5] : memref<1x16xf32, #tpu.memory_space<vmem>>, vector<1x16xf32>
    %5 = vector.broadcast %4 : vector<1x16xf32> to vector<64x16xf32>
    %6 = arith.addf %3, %5 : vector<64x16xf32>
    %cst_6 = arith.constant 0.000000e+00 : f32
    %7 = vector.broadcast %cst_6 : f32 to vector<64x16xf32>
    %8 = arith.maximumf %6, %7 : vector<64x16xf32>
    %c0_7 = arith.constant 0 : index
    %c0_8 = arith.constant 0 : index
    %9 = vector.load %arg5[%c0_7, %c0_8] : memref<16x32xf32, #tpu.memory_space<vmem>>, vector<16x32xf32>
    %cst_9 = arith.constant dense<0.000000e+00> : vector<64x32xf32>
    %10 = tpu.matmul %8, %9, %cst_9 {dimension_numbers = #tpu.dot_dimension_numbers<[1], [0], [0], [1], [0, 0, 1, 1], [], []>} : vector<64x16xf32>, vector<16x32xf32>, vector<64x32xf32> -> vector<64x32xf32>
    %11 = vector.shape_cast %10 : vector<64x32xf32> to vector<8x8x32xf32>
    %c0_10 = arith.constant 0 : index
    %c0_11 = arith.constant 0 : index
    %c0_12 = arith.constant 0 : index
    %12 = vector.load %arg2[%c0_10, %c0_11, %c0_12] : memref<8x8x1xbf16, #tpu.memory_space<vmem>>, vector<8x8x1xbf16>
    %13 = arith.extf %12 : vector<8x8x1xbf16> to vector<8x8x1xf32>
    %14 = vector.broadcast %13 : vector<8x8x1xf32> to vector<8x8x32xf32>
    %15 = arith.addf %11, %14 : vector<8x8x32xf32>
    %cst_13 = arith.constant dense<0xFF800000> : vector<8x32xf32>
    %16 = vector.multi_reduction <maximumf>, %15, %cst_13 [1] : vector<8x8x32xf32> to vector<8x32xf32>
    %17 = vector.shape_cast %16 : vector<8x32xf32> to vector<8x1x32xf32>
    %18 = vector.broadcast %17 : vector<8x1x32xf32> to vector<8x8x32xf32>
    %19 = arith.subf %15, %18 : vector<8x8x32xf32>
    %20 = math.exp %19 : vector<8x8x32xf32>
    %21 = arith.mulf %20, %0 : vector<8x8x32xf32>
    %cst_14 = arith.constant dense<0.000000e+00> : vector<8x32xf32>
    %22 = vector.multi_reduction <add>, %21, %cst_14 [1] : vector<8x8x32xf32> to vector<8x32xf32>
    %cst_15 = arith.constant dense<0.000000e+00> : vector<8x32xf32>
    %23 = vector.multi_reduction <add>, %20, %cst_15 [1] : vector<8x8x32xf32> to vector<8x32xf32>
    %24 = arith.divf %22, %23 : vector<8x32xf32>
    %c0_16 = arith.constant 0 : index
    %c0_17 = arith.constant 0 : index
    %25 = vector.load %arg6[%c0_16, %c0_17] : memref<8x32xf32, #tpu.memory_space<vmem>>, vector<8x32xf32>
    tpu.vector_store %arg6[%c0_16, %c0_17], %24 {strides = array<i32>} : memref<8x32xf32, #tpu.memory_space<vmem>>, vector<8x32xf32>,
    return
  }
  func.func @transform_0(%arg0: i32) -> (i32, i32, i32) {
    %c0_i32 = arith.constant 0 : i32
    %c0_i32_0 = arith.constant 0 : i32
    %c0_i32_1 = arith.constant 0 : i32
    return %arg0, %c0_i32, %c0_i32_0 : i32, i32, i32
  }
  func.func @transform_1(%arg0: i32) -> (i32, i32, i32) {
    %c0_i32 = arith.constant 0 : i32
    %c0_i32_0 = arith.constant 0 : i32
    %c0_i32_1 = arith.constant 0 : i32
    return %arg0, %c0_i32, %c0_i32_0 : i32, i32, i32
  }
  func.func @transform_2(%arg0: i32) -> (i32, i32) {
    %c0_i32 = arith.constant 0 : i32
    %c0_i32_0 = arith.constant 0 : i32
    %c0_i32_1 = arith.constant 0 : i32
    return %c0_i32, %c0_i32_0 : i32, i32
  }
  func.func @transform_3(%arg0: i32) -> (i32, i32) {
    %c0_i32 = arith.constant 0 : i32
    %c0_i32_0 = arith.constant 0 : i32
    %c0_i32_1 = arith.constant 0 : i32
    return %c0_i32, %c0_i32_0 : i32, i32
  }
  func.func @transform_4(%arg0: i32) -> (i32, i32) {
    %c0_i32 = arith.constant 0 : i32
    %c0_i32_0 = arith.constant 0 : i32
    %c0_i32_1 = arith.constant 0 : i32
    return %c0_i32, %c0_i32_0 : i32, i32
  }
  func.func @transform_5(%arg0: i32) -> (i32, i32) {
    %c0_i32 = arith.constant 0 : i32
    %c0_i32_0 = arith.constant 0 : i32
    return %arg0, %c0_i32 : i32, i32
  }
}

</mosaic_0001>

<bundles_post_ra>
// kernel: tpu_custom_call.1
= control target key start
LH: loop header
LB: loop body
LE: loop exit
PB: predicated region body
PF: predicated region fallthrough
CT: control target
= control target key end

     0   :  { %vm40_vm0 = vcmask 261120   ;;  %s1012_s0 = inlined_call_operand.vmem [shape: f32[8,8,32], index: 0, kind: input, shape index: {}]   ;;  %s1013_s1 = inlined_call_operand.vmem [shape: bf16[8,8,1], index: 1, kind: input, shape index: {}]   ;;  %s1014_s2 = inlined_call_operand.vmem [shape: f32[32,16], index: 2, kind: input, shape index: {}]   ;;  %s1015_s3 = inlined_call_operand.vmem [shape: f32[1,16], index: 3, kind: input, shape index: {}]   ;;  %s1016_s4 = inlined_call_operand.vmem [shape: f32[16,32], index: 4, kind: input, shape index: {}]   ;;  %s1017_s5 = inlined_call_operand.hbm [shape: f32[8,32], index: 5, kind: output, shape index: {}]  }
   0x1   :  { %v29_v0 = vld [vmem:[%s1014_s2] sm:$0xff]  ;;  %v30_v1 = vld [vmem:[%s1014_s2 + $0x8] sm:$0xff]  ;;  %v31_v2 = vld [vmem:[%s1014_s2 + $0x10] sm:$0xff] }
   0x2   :  { %v722_v3 = vpack.c.bf16 %v30_v1, %v29_v0  ;;  %v32_v4 = vld [vmem:[%s1014_s2 + $0x18] sm:$0xff]  ;;  %v869_v5 = vld [vmem:[%s1012_s0] sm:$0xff] }
   0x3   :  { %v726_v6 = vpack.c.bf16 %v32_v4, %v31_v2  ;;  %694 = vmatprep.mubr.msk.f32.mxu0 %vm40_vm0, %v869_v5 }
   0x4   :  { %723 = vmatprep.subr.bf16.mxu0 %v722_v3 }
   0x5   :  { %725 = vmatpush3.bf16.msra.mxu0 %v722_v3 }
   0x6   :  { %10 = vsyncpa [#allocation3], 0  ;;  %727 = vmatprep.subr.bf16.mxu0 %v726_v6  ;;  %v876_v7 = vld [vmem:[%s1012_s0 + $0x8] sm:$0xff]  ;;  %v881_v8 = vld [vmem:[%s1012_s0 + $0x10] sm:$0xff]  ;;  %v822_v20 = vmov 0   ;;  %vm180_vm1 = vcmask 130048  }
   0x7   :  { %v890_v9 = vld [vmem:[%s1012_s0 + $0x18] sm:$0xff]  ;;  %v895_v10 = vld [vmem:[%s1012_s0 + $0x20] sm:$0xff]  ;;  %v904_v11 = vld [vmem:[%s1012_s0 + $0x28] sm:$0xff]  ;;  %736 = vset.pattern.permute.xlu0 %v822_v20  ;;  %747 = vset.pattern.permute.xlu1 %v822_v20  ;;  %vm598_vm2 = vcmask 1041409   ;;  %vm600_vm3 = vcmask 1042434   ;;  %vm602_vm4 = vcmask 1043459  }
   0x8   :  { %v909_v12 = vld [vmem:[%s1012_s0 + $0x30] sm:$0xff]  ;;  %v918_v13 = vld [vmem:[%s1012_s0 + $0x38] sm:$0xff]  ;;  %v178_v14 = vld [vmem:[%s1016_s4] sm:$0xff]  ;;  %vm604_vm5 = vcmask 1044484   ;;  %vm606_vm6 = vcmask 1045509   ;;  %vm608_vm7 = vcmask 1046534  }
   0x9   :  { %729 = vmatpush3.bf16.msra.mxu0 %v726_v6  ;;  %v179_v15 = vld [vmem:[%s1016_s4 + $0x8] sm:$0xff]  ;;  %v646_v17 = vld [vmem:[%s1013_s1] sm:$0xff]   ;;  %v662_v19 = vld [vmem:[%s1013_s1 + $0x10] sm:$0xff]   ;;  %vm610_vm8 = vcmask 1047559  }
   0xa   :  { %v730_v16 = vpack.c.bf16 %v179_v15, %v178_v14  ;;  %v661_v18 = vld [vmem:[%s1013_s1 + $0x8] sm:$0xff]   ;;  %v647_v21 = vunpack.c.l.bf16 %v646_v17  ;;  %v648_v22 = vunpack.c.h.bf16 %v646_v17  ;;  %v663_v25 = vld [vmem:[%s1013_s1 + $0x18] sm:$0xff]   ;;  %v655_v26 = vunpack.c.l.bf16 %v662_v19  ;;  %v628_v34 = vld [vmem:[%s1015_s3] ss:$0 sm:$0xff]  ;;  %s823_s1 = smov [#allocation2]  }
   0xb   :  { %v651_v23 = vunpack.c.l.bf16 %v661_v18  ;;  %v652_v24 = vunpack.c.h.bf16 %v661_v18  ;;  %v656_v27 = vunpack.c.h.bf16 %v662_v19  ;;  %v659_v28 = vunpack.c.l.bf16 %v663_v25  ;;  %s620_s3 = sshll.u32 %s823_s1, 4  ;;  %s621_s3 = int_to_ptr.vmem [resolvable:$true] %s620_s3 }
   0xc   :  { %695 = vmatmul.mubr.msk.f32.vlgmr.msra.gmra.mrb[0].mxu0 %vm40_vm0, %v876_v7  ;;  %731 = vmatprep.subr.bf16.mxu1 %v730_v16  ;;  %v660_v29 = vunpack.c.h.bf16 %v663_v25  ;;  %v737_v30 = vpack.i.bf16 %v648_v22, %v647_v21  ;;  %s798_s28 = scalar_lea.vmem %s621_s3, 128  ;;  %p803_p1 = scmp.lt.s32.totalorder %s621_s3, %s621_s3 }
   0xd   :  { %697 = vmatprep.mubr.msk.f32.mxu0 %vm40_vm0, %v881_v8  ;;  %733 = vmatpush3.bf16.msra.mxu1 %v730_v16  ;;  %v748_v31 = vpack.i.bf16 %v656_v27, %v655_v26  ;;  %v742_v32 = vpack.i.bf16 %v652_v24, %v651_v23  ;;  %p799_p0 = scmp.ne.s32.totalorder %s621_s3, %s798_s28  ;;  %p804_p2 = scmp.lt.s32.totalorder %s798_s28, %s798_s28 }
   0xe   :  { %738 = vperm.xlu0 %736, %v737_v30   ;;  %v753_v33 = vpack.i.bf16 %v660_v29, %v659_v28 }
   0xf   :  { %749 = vperm.xlu1 %747, %v748_v31   ;;  %p805_p3 = por %p804_p2, %p803_p1 }
  0x10   :  { %698 = vmatmul.mubr.msk.f32.gmra.mrb[2].mxu0 %vm40_vm0, %v890_v9 }
  0x11   :  { %700 = vmatprep.mubr.msk.f32.mxu0 %vm40_vm0, %v895_v10  ;;  %p806_p4 = pnand %p805_p3, %p799_p0 }
  0x12   :  { %743 = vperm.xlu0 %736, %v742_v32  }
  0x13   :  { %754 = vperm.xlu1 %747, %v753_v33  }
  0x14   :  { %701 = vmatmul.mubr.msk.f32.gmra.mrb[4].mxu0 %vm40_vm0, %v904_v11 }
  0x15   :  { %703 = vmatprep.mubr.msk.f32.mxu0 %vm40_vm0, %v909_v12 }
  0x18   :  { %704 = vmatmul.mubr.msk.f32.gmra.mrb[6].mxu0 %vm40_vm0, %v918_v13 }
  0x8d   :  { %v739_v59 = vpop.permute.xlu0 %738 }
  0x8e   :  { %v750_v0 = vpop.permute.xlu1 %749 }
  0x91   :  { %v744_v60 = vpop.permute.xlu0 %743 }
  0x92   :  { %v755_v21 = vpop.permute.xlu1 %754 }
  0xdf   :  { %v696_v35 = vpop.f32.mrb[0].mxu0 }
  0xe0   :  { %v137_v36 = vadd.f32 %v696_v35, %v628_v34  ;;  %v131_v37 = vpop.f32.mrb[1].mxu0 }
  0xe1   :  { %v132_v38 = vadd.f32 %v628_v34, %v131_v37 }
  0xe2   :  { %v171_v41 = vmax.f32 %v137_v36, 0.0 }
  0xe3   :  { %v170_v39 = vmax.f32 %v132_v38, 0.0  ;;  %v699_v40 = vpop.f32.mrb[2].mxu0 }
  0xe4   :  { %v147_v42 = vadd.f32 %v699_v40, %v628_v34  ;;  %v141_v43 = vpop.f32.mrb[3].mxu0 }
  0xe5   :  { %v142_v44 = vadd.f32 %v628_v34, %v141_v43  ;;  %710 = vmatprep.mubr.msk.f32.mxu1 %vm180_vm1, %v170_v39 }
  0xe6   :  { %711 = vmatmul.mubr.msk.f32.vlgmr.msra.gmra.mrb[0].mxu1 %vm180_vm1, %v171_v41  ;;  %v173_v47 = vmax.f32 %v147_v42, 0.0 }
  0xe7   :  { %v172_v45 = vmax.f32 %v142_v44, 0.0  ;;  %v702_v46 = vpop.f32.mrb[4].mxu0 }
  0xe8   :  { %v157_v48 = vadd.f32 %v702_v46, %v628_v34  ;;  %v151_v49 = vpop.f32.mrb[5].mxu0 }
  0xe9   :  { %v152_v50 = vadd.f32 %v628_v34, %v151_v49  ;;  %713 = vmatprep.mubr.msk.f32.mxu1 %vm180_vm1, %v172_v45 }
  0xea   :  { %714 = vmatmul.mubr.msk.f32.gmra.mrb[2].mxu1 %vm180_vm1, %v173_v47  ;;  %v175_v53 = vmax.f32 %v157_v48, 0.0 }
  0xeb   :  { %v174_v51 = vmax.f32 %v152_v50, 0.0  ;;  %v705_v52 = vpop.f32.mrb[6].mxu0 }
  0xec   :  { %v167_v54 = vadd.f32 %v705_v52, %v628_v34  ;;  %v161_v55 = vpop.f32.mrb[7].mxu0 }
  0xed   :  { %v162_v56 = vadd.f32 %v628_v34, %v161_v55  ;;  %716 = vmatprep.mubr.msk.f32.mxu1 %vm180_vm1, %v174_v51 }
  0xee   :  { %717 = vmatmul.mubr.msk.f32.gmra.mrb[4].mxu1 %vm180_vm1, %v175_v53  ;;  %v177_v58 = vmax.f32 %v167_v54, 0.0 }
  0xef   :  { %v176_v57 = vmax.f32 %v162_v56, 0.0 }
  0xf1   :  { %719 = vmatprep.mubr.msk.f32.mxu1 %vm180_vm1, %v176_v57 }
  0xf2   :  { %720 = vmatmul.mubr.msk.f32.gmra.mrb[6].mxu1 %vm180_vm1, %v177_v58 }
 0x1b9   :  { %v712_v61 = vpop.f32.mrb[0].mxu1 }
 0x1ba   :  { %v790_v62 = vadd.high.f32.bf16 %v712_v61, %v739_v59  ;;  %v271_v63 = vpop.f32.mrb[1].mxu1 }
 0x1bb   :  { %v791_v1 = vadd.low.f32.bf16 %v271_v63, %v739_v59 }
 0x1bc   :  { %v381_v2 = vsel %vm40_vm0, %v790_v62, -inf }
 0x1bd   :  { %v382_v3 = vrot.slane %v381_v2, 4  ;;  %v374_v4 = vsel %vm40_vm0, %v791_v1, -inf  ;;  %v715_v6 = vpop.f32.mrb[2].mxu1 }
 0x1be   :  { %v375_v14 = vrot.slane %v374_v4, 4  ;;  %v953_v15 = vadd.high.f32.bf16 %v715_v6, %v744_v60  ;;  %v281_v16 = vpop.f32.mrb[3].mxu1 }
 0x1bf   :  { %v383_v17 = vmax.f32 %v381_v2, %v382_v3  ;;  %v955_v18 = vadd.low.f32.bf16 %v281_v16, %v744_v60 }
 0x1c0   :  { %v376_v19 = vmax.f32 %v374_v4, %v375_v14  ;;  %v395_v20 = vsel %vm40_vm0, %v953_v15, -inf }
 0x1c1   :  { %v384_v22 = vrot.slane %v383_v17, 2  ;;  %v396_v23 = vrot.slane %v395_v20, 4  ;;  %v388_v24 = vsel %vm40_vm0, %v955_v18, -inf  ;;  %v718_v25 = vpop.f32.mrb[4].mxu1 }
 0x1c2   :  { %v377_v26 = vrot.slane %v376_v19, 2  ;;  %v389_v27 = vrot.slane %v388_v24, 4  ;;  %v961_v28 = vadd.high.f32.bf16 %v718_v25, %v750_v0  ;;  %v291_v29 = vpop.f32.mrb[5].mxu1 }
 0x1c3   :  { %v385_v30 = vmax.f32 %v383_v17, %v384_v22  ;;  %v397_v31 = vmax.f32 %v395_v20, %v396_v23  ;;  %v795_v32 = vadd.low.f32.bf16 %v291_v29, %v750_v0 }
 0x1c4   :  { %v378_v33 = vmax.f32 %v376_v19, %v377_v26  ;;  %v390_v34 = vmax.f32 %v388_v24, %v389_v27  ;;  %v409_v35 = vsel %vm40_vm0, %v961_v28, -inf }
 0x1c5   :  { %v386_v36 = vrot.slane %v385_v30, 1  ;;  %v398_v37 = vrot.slane %v397_v31, 2  ;;  %v410_v38 = vrot.slane %v409_v35, 4  ;;  %v402_v39 = vsel %vm40_vm0, %v795_v32, -inf  ;;  %v721_v40 = vpop.f32.mrb[6].mxu1 }
 0x1c6   :  { %v379_v41 = vrot.slane %v378_v33, 1  ;;  %v391_v42 = vrot.slane %v390_v34, 2  ;;  %v403_v43 = vrot.slane %v402_v39, 4  ;;  %v796_v44 = vadd.high.f32.bf16 %v721_v40, %v755_v21  ;;  %v301_v45 = vpop.f32.mrb[7].mxu1 }
 0x1c7   :  { %v387_v46 = vmax.f32 %v385_v30, %v386_v36  ;;  %v399_v47 = vmax.f32 %v397_v31, %v398_v37  ;;  %v411_v48 = vmax.f32 %v409_v35, %v410_v38  ;;  %v966_v49 = vadd.low.f32.bf16 %v301_v45, %v755_v21 }
 0x1c8   :  { %v380_v50 = vmax.f32 %v378_v33, %v379_v41  ;;  %v392_v51 = vmax.f32 %v390_v34, %v391_v42  ;;  %v404_v52 = vmax.f32 %v402_v39, %v403_v43  ;;  %v423_v53 = vsel %vm40_vm0, %v796_v44, -inf }
 0x1c9   :  { %v431_v54 = vsub.f32 %v790_v62, %v387_v46  ;;  %v400_v55 = vrot.slane %v399_v47, 1  ;;  %v412_v56 = vrot.slane %v411_v48, 2  ;;  %v424_v57 = vrot.slane %v423_v53, 4 }
 0x1ca   :  { %v430_v58 = vsub.f32 %v791_v1, %v380_v50  ;;  %v393_v59 = vrot.slane %v392_v51, 1  ;;  %v405_v60 = vrot.slane %v404_v52, 2  ;;  %v416_v61 = vsel %vm40_vm0, %v966_v49, -inf }
 0x1cb   :  { %v440_v63 = vmul.f32 1.442695, %v431_v54  ;;  %v401_v0 = vmax.f32 %v399_v47, %v400_v55  ;;  %v413_v2 = vmax.f32 %v411_v48, %v412_v56  ;;  %v425_v3 = vmax.f32 %v423_v53, %v424_v57 }
 0x1cc   :  { %v438_v4 = vmul.f32 1.442695, %v430_v58  ;;  %v394_v6 = vmax.f32 %v392_v51, %v393_v59  ;;  %v406_v14 = vmax.f32 %v404_v52, %v405_v60  ;;  %v417_v16 = vrot.slane %v416_v61, 4 }
 0x1cd   :  { %758 = vpow2.f32 %v440_v63  ;;  %v433_v62 = vsub.f32 %v953_v15, %v401_v0  ;;  %v414_v17 = vrot.slane %v413_v2, 1  ;;  %v426_v19 = vrot.slane %v425_v3, 2 }
 0x1ce   :  { %760 = vpow2.f32 %v438_v4  ;;  %v432_v1 = vsub.f32 %v955_v18, %v394_v6  ;;  %v407_v20 = vrot.slane %v406_v14, 1  ;;  %v418_v21 = vmax.f32 %v416_v61, %v417_v16 }
 0x1cf   :  { %v444_v22 = vmul.f32 1.442695, %v433_v62  ;;  %v415_v23 = vmax.f32 %v413_v2, %v414_v17  ;;  %v427_v24 = vmax.f32 %v425_v3, %v426_v19 }
 0x1d0   :  { %v442_v25 = vmul.f32 1.442695, %v432_v1  ;;  %v408_v26 = vmax.f32 %v406_v14, %v407_v20  ;;  %v419_v27 = vrot.slane %v418_v21, 2 }
 0x1d1   :  { %762 = vpow2.f32 %v444_v22  ;;  %v435_v29 = vsub.f32 %v961_v28, %v415_v23  ;;  %v428_v30 = vrot.slane %v427_v24, 1 }
 0x1d2   :  { %764 = vpow2.f32 %v442_v25  ;;  %v434_v31 = vsub.f32 %v795_v32, %v408_v26  ;;  %v420_v15 = vmax.f32 %v418_v21, %v419_v27 }
 0x1d3   :  { %v429_v33 = vmax.f32 %v427_v24, %v428_v30  ;;  %v448_v34 = vmul.f32 1.442695, %v435_v29 }
 0x1d4   :  { %v446_v36 = vmul.f32 1.442695, %v434_v31  ;;  %v421_v18 = vrot.slane %v420_v15, 1 }
 0x1d5   :  { %v437_v35 = vsub.f32 %v796_v44, %v429_v33  ;;  %766 = vpow2.f32 %v448_v34 }
 0x1d6   :  { %768 = vpow2.f32 %v446_v36  ;;  %v422_v44 = vmax.f32 %v420_v15, %v421_v18 }
 0x1d7   :  { %v759_v37 = vpop.eup %758  ;;  %v452_v38 = vmul.f32 1.442695, %v437_v35 }
 0x1d8   :  { %v761_v39 = vpop.eup %760  ;;  %v455_v40 = vmul.f32 %v759_v37, %v876_v7  ;;  %v525_v41 = vsel %vm40_vm0, %v759_v37, 0.0  ;;  %v436_v62 = vsub.f32 %v966_v49, %v422_v44 }
 0x1d9   :  { %v526_v42 = vrot.slane %v525_v41, 4  ;;  %v454_v43 = vmul.f32 %v761_v39, %v869_v5  ;;  %v518_v28 = vsel %vm40_vm0, %v761_v39, 0.0  ;;  %770 = vpow2.f32 %v452_v38 }
 0x1da   :  { %v469_v32 = vsel %vm40_vm0, %v455_v40, 0.0  ;;  %v519_v45 = vrot.slane %v518_v28, 4  ;;  %v450_v31 = vmul.f32 1.442695, %v436_v62 }
 0x1db   :  { %v763_v46 = vpop.eup %762  ;;  %v470_v47 = vrot.slane %v469_v32, 4  ;;  %v527_v48 = vadd.f32 %v526_v42, %v525_v41  ;;  %v462_v50 = vsel %vm40_vm0, %v454_v43, 0.0 }
 0x1dc   :  { %v765_v7 = vpop.eup %764  ;;  %v463_v51 = vrot.slane %v462_v50, 4  ;;  %v520_v52 = vadd.f32 %v519_v45, %v518_v28  ;;  %v457_v53 = vmul.f32 %v763_v46, %v890_v9  ;;  %v539_v5 = vsel %vm40_vm0, %v763_v46, 0.0 }
 0x1dd   :  { %v471_v54 = vadd.f32 %v470_v47, %v469_v32  ;;  %v528_v55 = vrot.slane %v527_v48, 2  ;;  %v540_v56 = vrot.slane %v539_v5, 4  ;;  %v456_v57 = vmul.f32 %v765_v7, %v881_v8 }
 0x1de   :  { %v464_v58 = vadd.f32 %v463_v51, %v462_v50  ;;  %v521_v59 = vrot.slane %v520_v52, 2  ;;  %v483_v60 = vsel %vm40_vm0, %v457_v53, 0.0  ;;  %v532_v61 = vsel %vm40_vm0, %v765_v7, 0.0 }
 0x1df   :  { %v529_v63 = vadd.f32 %v528_v55, %v527_v48  ;;  %v541_v0 = vadd.f32 %v540_v56, %v539_v5  ;;  %v484_v3 = vrot.slane %v483_v60, 4  ;;  %v476_v4 = vsel %vm40_vm0, %v456_v57, 0.0  ;;  %v767_v20 = vpop.eup %766 }
 0x1e0   :  { %v522_v2 = vadd.f32 %v521_v59, %v520_v52  ;;  %v533_v9 = vrot.slane %v532_v61, 4  ;;  %v472_v6 = vrot.slane %v471_v54, 2  ;;  %v465_v17 = vrot.slane %v464_v58, 2  ;;  %v769_v23 = vpop.eup %768 }
 0x1e1   :  { %v530_v14 = vrot.slane %v529_v63, 1  ;;  %v542_v16 = vrot.slane %v541_v0, 2  ;;  %v477_v19 = vrot.slane %v476_v4, 4  ;;  %v485_v25 = vadd.f32 %v484_v3, %v483_v60 }
 0x1e2   :  { %v523_v8 = vrot.slane %v522_v2, 1  ;;  %v534_v1 = vadd.f32 %v533_v9, %v532_v61  ;;  %v473_v15 = vadd.f32 %v472_v6, %v471_v54  ;;  %v466_v33 = vadd.f32 %v465_v17, %v464_v58 }
 0x1e3   :  { %v531_v21 = vadd.f32 %v530_v14, %v529_v63  ;;  %v543_v22 = vadd.f32 %v542_v16, %v541_v0  ;;  %v771_v27 = vpop.eup %770  ;;  %v478_v30 = vadd.f32 %v477_v19, %v476_v4  ;;  %v459_v35 = vmul.f32 %v767_v20, %v904_v11 }
 0x1e4   :  { %v524_v24 = vadd.f32 %v523_v8, %v522_v2  ;;  %v535_v26 = vrot.slane %v534_v1, 2  ;;  %v553_v36 = vsel %vm40_vm0, %v767_v20, 0.0  ;;  %v458_v18 = vmul.f32 %v769_v23, %v895_v10 }
 0x1e5   :  { %772 = vrcp.f32 %v531_v21  ;;  %v544_v29 = vrot.slane %v543_v22, 1  ;;  %v486_v37 = vrot.slane %v485_v25, 2  ;;  %v554_v39 = vrot.slane %v553_v36, 4 }
 0x1e6   :  { %774 = vrcp.f32 %v524_v24  ;;  %v536_v49 = vadd.f32 %v535_v26, %v534_v1  ;;  %v546_v40 = vsel %vm40_vm0, %v769_v23, 0.0  ;;  %v479_v41 = vrot.slane %v478_v30, 2 }
 0x1e7   :  { %v545_v34 = vadd.f32 %v544_v29, %v543_v22  ;;  %v497_v42 = vsel %vm40_vm0, %v459_v35, 0.0  ;;  %v490_v43 = vsel %vm40_vm0, %v458_v18, 0.0  ;;  %v547_v28 = vrot.slane %v546_v40, 4 }
 0x1e8   :  { %v537_v38 = vrot.slane %v536_v49, 1  ;;  %v467_v32 = vrot.slane %v466_v33, 1  ;;  %v555_v44 = vadd.f32 %v554_v39, %v553_v36  ;;  %v498_v11 = vrot.slane %v497_v42, 4 }
 0x1e9   :  { %776 = vrcp.f32 %v545_v34  ;;  %v491_v46 = vrot.slane %v490_v43, 4  ;;  %v548_v47 = vadd.f32 %v547_v28, %v546_v40  ;;  %v567_v10 = vsel %vm40_vm0, %v771_v27, 0.0 }
 0x1ea   :  { %v538_v45 = vadd.f32 %v537_v38, %v536_v49  ;;  %v474_v48 = vrot.slane %v473_v15, 1  ;;  %v556_v50 = vrot.slane %v555_v44, 2  ;;  %v568_v7 = vrot.slane %v567_v10, 4 }
 0x1eb   :  { %v480_v51 = vadd.f32 %v479_v41, %v478_v30  ;;  %v549_v52 = vrot.slane %v548_v47, 2  ;;  %v487_v53 = vadd.f32 %v486_v37, %v485_v25  ;;  %v492_v54 = vadd.f32 %v491_v46, %v490_v43 }
 0x1ec   :  { %778 = vrcp.f32 %v538_v45  ;;  %v557_v5 = vadd.f32 %v556_v50, %v555_v44  ;;  %v468_v56 = vadd.f32 %v467_v32, %v466_v33  ;;  %v499_v57 = vadd.f32 %v498_v11, %v497_v42 }
 0x1ed   :  { %780 = vpow2.f32 %v450_v31  ;;  %v550_v58 = vadd.f32 %v549_v52, %v548_v47  ;;  %v475_v60 = vadd.f32 %v474_v48, %v473_v15  ;;  %v569_v63 = vadd.f32 %v568_v7, %v567_v10 }
 0x1ee   :  { %v558_v61 = vrot.slane %v557_v5, 1  ;;  %v481_v0 = vrot.slane %v480_v51, 1  ;;  %v493_v9 = vrot.slane %v492_v54, 2  ;;  %v488_v6 = vrot.slane %v487_v53, 1 }
 0x1ef   :  { %v773_v55 = vpop.eup %772  ;;  %v551_v2 = vrot.slane %v550_v58, 1  ;;  %v461_v62 = vmul.f32 %v771_v27, %v918_v13  ;;  %v500_v17 = vrot.slane %v499_v57, 2  ;;  %v570_v19 = vrot.slane %v569_v63, 2 }
 0x1f0   :  { %v775_v59 = vpop.eup %774  ;;  %v559_v4 = vadd.f32 %v558_v61, %v557_v5  ;;  %v577_v14 = vmul.f32 %v773_v55, %v475_v60  ;;  %v482_v1 = vadd.f32 %v481_v0, %v480_v51  ;;  %v489_v22 = vadd.f32 %v488_v6, %v487_v53 }
 0x1f1   :  { %v575_v3 = vmul.f32 %v775_v59, %v468_v56  ;;  %v552_v16 = vadd.f32 %v551_v2, %v550_v58  ;;  %v494_v23 = vadd.f32 %v493_v9, %v492_v54  ;;  %v501_v25 = vadd.f32 %v500_v17, %v499_v57 }
 0x1f2   :  { %782 = vrcp.f32 %v559_v4  ;;  %v511_v26 = vsel %vm40_vm0, %v461_v62, 0.0  ;;  %v571_v30 = vadd.f32 %v570_v19, %v569_v63 }
 0x1f3   :  { %v777_v8 = vpop.eup %776  ;;  %784 = vrcp.f32 %v552_v16  ;;  %v599_v20 = vsel %vm598_vm2, %v577_v14, %v575_v3  ;;  %v495_v49 = vrot.slane %v494_v23, 1  ;;  %v502_v18 = vrot.slane %v501_v25, 1 }
 0x1f4   :  { %v581_v31 = vmul.f32 %v777_v8, %v489_v22  ;;  %v512_v38 = vrot.slane %v511_v26, 4  ;;  %v572_v39 = vrot.slane %v571_v30, 1 }
 0x1f5   :  { %v496_v42 = vadd.f32 %v495_v49, %v494_v23  ;;  %v503_v32 = vadd.f32 %v502_v18, %v501_v25 }
 0x1f6   :  { %v779_v21 = vpop.eup %778  ;;  %v513_v45 = vadd.f32 %v512_v38, %v511_v26  ;;  %v573_v44 = vadd.f32 %v572_v39, %v571_v30 }
 0x1f7   :  { %v781_v24 = vpop.eup %780  ;;  %v579_v29 = vmul.f32 %v779_v21, %v482_v1 }
 0x1f8   :  { %v460_v13 = vmul.f32 %v781_v24, %v909_v12  ;;  %v560_v27 = vsel %vm40_vm0, %v781_v24, 0.0  ;;  %v514_v7 = vrot.slane %v513_v45, 2  ;;  %786 = vrcp.f32 %v573_v44 }
 0x1f9   :  { %v561_v15 = vrot.slane %v560_v27, 4  ;;  %v601_v33 = vsel %vm600_vm3, %v579_v29, %v599_v20 }
 0x1fa   :  { %v504_v34 = vsel %vm40_vm0, %v460_v13, 0.0  ;;  %v603_v35 = vsel %vm602_vm4, %v581_v31, %v601_v33  ;;  %v515_v53 = vadd.f32 %v514_v7, %v513_v45 }
 0x1fb   :  { %v562_v36 = vadd.f32 %v561_v15, %v560_v27  ;;  %v505_v37 = vrot.slane %v504_v34, 4 }
 0x1fc   :  { %v783_v41 = vpop.eup %782  ;;  %v516_v54 = vrot.slane %v515_v53, 1 }
 0x1fd   :  { %v563_v40 = vrot.slane %v562_v36, 2  ;;  %v506_v43 = vadd.f32 %v505_v37, %v504_v34  ;;  %v785_v28 = vpop.eup %784  ;;  %v585_v47 = vmul.f32 %v783_v41, %v503_v32 }
 0x1fe   :  { %v583_v11 = vmul.f32 %v785_v28, %v496_v42  ;;  %v517_v58 = vadd.f32 %v516_v54, %v515_v53 }
 0x1ff   :  { %v564_v12 = vadd.f32 %v563_v40, %v562_v36  ;;  %v507_v10 = vrot.slane %v506_v43, 2 }
 0x200   :  { %v605_v48 = vsel %vm604_vm5, %v583_v11, %v603_v35 }
 0x201   :  { %v565_v46 = vrot.slane %v564_v12, 1  ;;  %v607_v51 = vsel %vm606_vm6, %v585_v47, %v605_v48  ;;  %v508_v52 = vadd.f32 %v507_v10, %v506_v43 }
 0x202   :  { %v787_v55 = vpop.eup %786 }
 0x203   :  { %v566_v50 = vadd.f32 %v565_v46, %v564_v12  ;;  %v509_v5 = vrot.slane %v508_v52, 1  ;;  %v589_v60 = vmul.f32 %v787_v55, %v517_v58 }
 0x205   :  { %788 = vrcp.f32 %v566_v50  ;;  %v510_v56 = vadd.f32 %v509_v5, %v508_v52 }
 0x20f   :  { %v789_v57 = vpop.eup %788 }
 0x210   :  { %v587_v59 = vmul.f32 %v789_v57, %v510_v56 }
 0x212   :  { %v609_v61 = vsel %vm608_vm7, %v587_v59, %v607_v51 }
 0x213   :  { %v611_v63 = vsel %vm610_vm8, %v589_v60, %v609_v61 }
 0x214   :  { %613 = vst.msk [vmem:[#allocation2] sm:$0xff] %vm40_vm0, %v611_v63 }
 0x215   :  { %809 = shalt.err (!%p806_p4)
}
 0x216   :  { %s810_s30 = scalar_lea.hbm %s1017_s5, 128 }
 0x217   :  { %p811_p5 = scmp.ne.s32.totalorder %s1017_s5, %s810_s30  ;;  %p814_p6 = scmp.lt.u32.totalorder %s810_s30, %s1017_s5 }
 0x219   :  { %p816_p7 = pnand %p814_p6, %p811_p5 }
 0x21b   :  { %819 = shalt.err (!%p816_p7)
}
 0x21c   :  { %623 = dma.vmem_to_hbm [thread:$0]  %s621_s3, 128, %s1017_s5, [#allocation3]  }
 0x21d   :  { %820 = dma.done.wait [#allocation3], 128  }
 0x21e   :  { %821 = vsyncadd [#allocation3], 4294967168 }
 0x21f   :  { %627 = vsyncpa [#allocation3], 1 }

</bundles_post_ra>
